<compile_context>
chip_gen: v6e
topology: v6e:2x2x1
jax: 0.10.0
libtpu: 0.0.40
codegen_flags: <defaults>
</compile_context>

<pallas_src>
import jax
import jax.numpy as jnp
from jax import lax
from jax.experimental import pallas as pl
from jax.experimental.pallas import tpu as pltpu

_EPS = 1e-12          # torch.nn.functional.normalize default eps
_EPS2 = _EPS * _EPS   # clamp on the squared norm (== clamping the norm)


def _make_kernel(tk, a_resident):
    def kernel(bt_ref, a_ref, binv_ref, ainv_ref, o_ref):
        # bt_ref  : (TQ, c)        raw B^T tile
        # a_ref   : (c, TK) or (c, hw_p) if resident
        # binv_ref: (TQ, 1)  f32   inverse L2 norms of the B columns
        # ainv_ref: (1, TK)  f32   inverse L2 norms of the A columns
        # o_ref   : (TQ, TK)
        if a_resident:
            ki = pl.program_id(2)
            col0 = pl.multiple_of(ki * tk, 128)
            a = a_ref[:, pl.ds(col0, tk)]
        else:
            a = a_ref[...]

        corr = jnp.dot(bt_ref[...], a, preferred_element_type=jnp.float32)
        # Rank-1 post-scale == normalizing both operands before the matmul.
        corr = corr * binv_ref[...] * ainv_ref[...]
        o_ref[...] = corr.astype(o_ref.dtype)

    return kernel


def feature_correlation(feature_A, feature_B):
    """Pallas equivalent of FeatureCorrelation.forward.

    feature_A, feature_B: (b, c, h, w)  ->  returns (b, h*w, h, w)
    """
    b, c, h, w = feature_A.shape
    hw = h * w
    dtype = feature_A.dtype
    itemsize = jnp.dtype(dtype).itemsize

    fa = feature_A.reshape(b, c, hw)                       # (b, c, hw)
    fb = feature_B.reshape(b, c, hw)                       # (b, c, hw)

    # Hoisted normalization: inverse channel-norms, f32, eps clamp on sumsq.
    fa32 = fa.astype(jnp.float32)
    fb32 = fb.astype(jnp.float32)
    ainv = lax.rsqrt(jnp.maximum(jnp.sum(fa32 * fa32, axis=1, keepdims=True), _EPS2))  # (b,1,hw)
    binv = lax.rsqrt(jnp.maximum(jnp.sum(fb32 * fb32, axis=1, keepdims=True), _EPS2))  # (b,1,hw)
    binv = jnp.transpose(binv, (0, 2, 1))                  # (b, hw, 1)

    fbt = jnp.transpose(fb, (0, 2, 1))                     # (b, hw, c)

    # Pad the spatial axis to a lane multiple for dense (unmasked) stores.
    hw_p = ((hw + 127) // 128) * 128
    if hw_p != hw:
        pad = hw_p - hw
        fa = jnp.pad(fa, ((0, 0), (0, 0), (0, pad)))
        fbt = jnp.pad(fbt, ((0, 0), (0, pad), (0, 0)))
        ainv = jnp.pad(ainv, ((0, 0), (0, 0), (0, pad)))
        binv = jnp.pad(binv, ((0, 0), (0, pad), (0, 0)))

    # Keep the whole (c, hw_p) A slab resident per batch when cheap
    # (double-buffered copy <= 8 MiB) -> A streamed from HBM exactly once.
    a_resident = (2 * c * hw_p * itemsize) <= (8 << 20)

    # Tile selection: largest square tile dividing hw_p that fits the budget.
    vmem_budget = 32 << 20

    def vmem_estimate(tq, tk):
        a_cols = hw_p if a_resident else tk
        buf = 2 * (tq * c + c * a_cols + tq * tk + tq + tk) * itemsize
        buf += tq * tk * 4          # f32 corr temporary
        return buf

    tile = 128
    for cand in (1024, 512, 256, 128):
        if hw_p % cand == 0 and vmem_estimate(cand, cand) <= vmem_budget:
            tile = cand
            break
    tq = tk = tile

    # v7x: ensure >= 2 parallel grid points so both TensorCores have work.
    if b * (hw_p // tq) * (hw_p // tk) < 2 and tq >= 256:
        tq //= 2

    nq, nk = hw_p // tq, hw_p // tk
    grid = (b, nq, nk)              # k innermost -> B^T tile reused across k

    if a_resident:
        a_spec = pl.BlockSpec((None, c, hw_p), lambda bi, qi, ki: (bi, 0, 0))
        a_bytes = b * c * hw_p * itemsize
    else:
        a_spec = pl.BlockSpec((None, c, tk), lambda bi, qi, ki: (bi, 0, ki))
        a_bytes = b * nq * c * hw_p * itemsize   # re-read once per q pass

    cost = pl.CostEstimate(
        flops=2 * b * c * hw_p * hw_p + 2 * b * hw_p * hw_p,
        bytes_accessed=(b * hw_p * c * itemsize            # B^T
                        + a_bytes                           # A
                        + 2 * b * hw_p * 4                  # inverse norms
                        + b * hw_p * hw_p * itemsize),      # output
        transcendentals=0,
    )

    out = pl.pallas_call(
        _make_kernel(tk, a_resident),
        out_shape=jax.ShapeDtypeStruct((b, hw_p, hw_p), dtype),
        grid=grid,
        in_specs=[
            # B^T tile: depends on (batch, q) only -> reused across k.
            pl.BlockSpec((None, tq, c), lambda bi, qi, ki: (bi, qi, 0)),
            # A: resident per batch, or tiled along k.
            a_spec,
            # Inverse norms (tiny).
            pl.BlockSpec((None, tq, 1), lambda bi, qi, ki: (bi, qi, 0)),
            pl.BlockSpec((None, 1, tk), lambda bi, qi, ki: (bi, 0, ki)),
        ],
        out_specs=pl.BlockSpec((None, tq, tk), lambda bi, qi, ki: (bi, qi, ki)),
        compiler_params=pltpu.CompilerParams(
            dimension_semantics=("parallel", "parallel", "parallel"),
            vmem_limit_bytes=48 << 20,
        ),
        cost_estimate=cost,
    )(fbt, fa, binv, ainv)

    if hw_p != hw:
        out = out[:, :hw, :hw]
    return out.reshape(b, hw, h, w)


def _reference(feature_A, feature_B):
    # Pure-JAX reference mirroring the PyTorch module.
    b, c, h, w = feature_A.shape

    def l2n(x):
        n = jnp.sqrt(jnp.sum(x * x, axis=1, keepdims=True))
        return x / jnp.maximum(n, _EPS)

    fa = l2n(feature_A).reshape(b, c, -1)              # (b, c, hw)
    fb = l2n(feature_B).reshape(b, c, -1)              # (b, c, hw)
    corr = jnp.einsum("bci,bcj->bij", fb, fa)          # (b, hw, hw)
    return corr.reshape(b, h * w, h, w)


if __name__ == "__main__":
    key = jax.random.PRNGKey(0)
    k1, k2 = jax.random.split(key)
    b, c, h, w = 2, 4, 16, 16
    feature_A = jax.random.normal(k1, (b, c, h, w), dtype=jnp.float32)
    feature_B = jax.random.normal(k2, (b, c, h, w), dtype=jnp.float32)

    out = feature_correlation(feature_A, feature_B)
    out = jax.block_until_ready(out)

    ref = _reference(feature_A, feature_B)
    assert out.shape == (b, h * w, h, w), out.shape
    assert jnp.allclose(out, ref, atol=1e-5, rtol=1e-5), "mismatch vs reference"

    print("KERNEL_OK")
</pallas_src>

<mosaic_0001>
module attributes {stable_mosaic.version = 11 : i64} {
  func.func @kernel(%arg0: i32, %arg1: i32, %arg2: i32, %arg3: memref<1x256x4xf32, #tpu.memory_space<vmem>>, %arg4: memref<1x4x256xf32, #tpu.memory_space<vmem>>, %arg5: memref<1x256x1xf32, #tpu.memory_space<vmem>>, %arg6: memref<1x1x256xf32, #tpu.memory_space<vmem>>, %arg7: memref<1x256x256xf32, #tpu.memory_space<vmem>>) attributes {dimension_semantics = [#tpu.dimension_semantics<parallel>, #tpu.dimension_semantics<parallel>, #tpu.dimension_semantics<parallel>], iteration_bounds = array<i64: 2, 1, 1>, scalar_prefetch = 0 : i64, scratch_operands = 0 : i64, tpu.core_type = #tpu.core_type<tc>, window_params = [{transform_indices = @transform_0, window_bounds = array<i64: 1, 256, 4>}, {transform_indices = @transform_1, window_bounds = array<i64: 1, 4, 256>}, {transform_indices = @transform_2, window_bounds = array<i64: 1, 256, 1>}, {transform_indices = @transform_3, window_bounds = array<i64: 1, 1, 256>}, {transform_indices = @transform_4, window_bounds = array<i64: 1, 256, 256>}]} {
    %c256_i32 = arith.constant 256 : i32
    %0 = arith.muli %arg2, %c256_i32 : i32
    %1 = tpu.assume_multiple %0, 128 : i32
    %c0 = arith.constant 0 : index
    %c0_0 = arith.constant 0 : index
    %2 = arith.index_cast %1 : i32 to index
    %3 = vector.load %arg4[%c0, %c0_0, %2] : memref<1x4x256xf32, #tpu.memory_space<vmem>>, vector<1x4x256xf32>
    %4 = vector.shape_cast %3 : vector<1x4x256xf32> to vector<4x256xf32>
    %c0_1 = arith.constant 0 : index
    %c0_2 = arith.constant 0 : index
    %c0_3 = arith.constant 0 : index
    %5 = vector.load %arg3[%c0_1, %c0_2, %c0_3] : memref<1x256x4xf32, #tpu.memory_space<vmem>>, vector<1x256x4xf32>
    %6 = vector.shape_cast %5 : vector<1x256x4xf32> to vector<256x4xf32>
    %cst = arith.constant dense<0.000000e+00> : vector<256x256xf32>
    %7 = tpu.matmul %6, %4, %cst {dimension_numbers = #tpu.dot_dimension_numbers<[1], [0], [0], [1], [0, 0, 1, 1], [], []>} : vector<256x4xf32>, vector<4x256xf32>, vector<256x256xf32> -> vector<256x256xf32>
    %c0_4 = arith.constant 0 : index
    %c0_5 = arith.constant 0 : index
    %c0_6 = arith.constant 0 : index
    %8 = vector.load %arg5[%c0_4, %c0_5, %c0_6] : memref<1x256x1xf32, #tpu.memory_space<vmem>>, vector<1x256x1xf32>
    %9 = vector.shape_cast %8 : vector<1x256x1xf32> to vector<256x1xf32>
    %10 = vector.broadcast %9 : vector<256x1xf32> to vector<256x256xf32>
    %11 = arith.mulf %7, %10 : vector<256x256xf32>
    %c0_7 = arith.constant 0 : index
    %c0_8 = arith.constant 0 : index
    %c0_9 = arith.constant 0 : index
    %12 = vector.load %arg6[%c0_7, %c0_8, %c0_9] : memref<1x1x256xf32, #tpu.memory_space<vmem>>, vector<1x1x256xf32>
    %13 = vector.shape_cast %12 : vector<1x1x256xf32> to vector<1x256xf32>
    %14 = vector.broadcast %13 : vector<1x256xf32> to vector<256x256xf32>
    %15 = arith.mulf %11, %14 : vector<256x256xf32>
    %c0_10 = arith.constant 0 : index
    %c0_11 = arith.constant 0 : index
    %c0_12 = arith.constant 0 : index
    %16 = vector.load %arg7[%c0_10, %c0_11, %c0_12] : memref<1x256x256xf32, #tpu.memory_space<vmem>>, vector<1x256x256xf32>
    %17 = vector.shape_cast %16 : vector<1x256x256xf32> to vector<256x256xf32>
    %18 = vector.shape_cast %15 : vector<256x256xf32> to vector<1x256x256xf32>
    tpu.vector_store %arg7[%c0_10, %c0_11, %c0_12], %18 {strides = array<i32>} : memref<1x256x256xf32, #tpu.memory_space<vmem>>, vector<1x256x256xf32>,
    return
  }
  func.func @transform_0(%arg0: i32, %arg1: i32, %arg2: i32) -> (i32, i32, i32) {
    %c0_i32 = arith.constant 0 : i32
    %c0_i32_0 = arith.constant 0 : i32
    return %arg0, %arg1, %c0_i32 : i32, i32, i32
  }
  func.func @transform_1(%arg0: i32, %arg1: i32, %arg2: i32) -> (i32, i32, i32) {
    %c0_i32 = arith.constant 0 : i32
    %c0_i32_0 = arith.constant 0 : i32
    %c0_i32_1 = arith.constant 0 : i32
    return %arg0, %c0_i32, %c0_i32_0 : i32, i32, i32
  }
  func.func @transform_2(%arg0: i32, %arg1: i32, %arg2: i32) -> (i32, i32, i32) {
    %c0_i32 = arith.constant 0 : i32
    %c0_i32_0 = arith.constant 0 : i32
    return %arg0, %arg1, %c0_i32 : i32, i32, i32
  }
  func.func @transform_3(%arg0: i32, %arg1: i32, %arg2: i32) -> (i32, i32, i32) {
    %c0_i32 = arith.constant 0 : i32
    %c0_i32_0 = arith.constant 0 : i32
    return %arg0, %c0_i32, %arg2 : i32, i32, i32
  }
  func.func @transform_4(%arg0: i32, %arg1: i32, %arg2: i32) -> (i32, i32, i32) {
    %c0_i32 = arith.constant 0 : i32
    return %arg0, %arg1, %arg2 : i32, i32, i32
  }
}

</mosaic_0001>

<bundles_post_ra>
// kernel: tpu_custom_call.1
= control target key start
LH: loop header
LB: loop body
LE: loop exit
PB: predicated region body
PF: predicated region fallthrough
CT: control target
= control target key end

     0   :  { %9 = vsyncpa [#allocation3], 0  ;;  %s1954_s0 = inlined_call_operand.vmem [shape: f32[2,256,4], index: 0, kind: input, shape index: {}]   ;;  %s1955_s1 = inlined_call_operand.vmem [shape: f32[2,4,256], index: 1, kind: input, shape index: {}]   ;;  %s1956_s2 = inlined_call_operand.vmem [shape: f32[2,256,1], index: 2, kind: input, shape index: {}]   ;;  %s1957_s3 = inlined_call_operand.vmem [shape: f32[2,1,256], index: 3, kind: input, shape index: {}]   ;;  %s1958_s4 = inlined_call_operand.hbm [shape: f32[2,256,256], index: 4, kind: output, shape index: {}]  }
   0x1   :  { %11 = vsyncpa [#allocation3 + $0x1], 0  ;;  %s1499_s15 = smov 0   ;;  %s1501_s16 = smov 0  }
   0x2   :  { %s1503_s17 = smov 0   ;;  %s1505_s18 = smov 0  }
   0x3   :  { %s1507_s19 = smov 0   ;;  %s1509_s20 = smov 0  }
   0x4 LB: > { %s1271_s21 = sadd.s32 4294967295, %s1467_s20   ;;  %s1272_s22 = sadd.s32 4294967294, %s1467_s20   ;;  %s1467_s20 = sphi %s1509_s20, %s17_s20   ;;  %s1463_s19 = sphi %s1507_s19, %s1965_s19   ;;  %s1459_s18 = sphi %s1505_s18, %s1964_s18   ;;  %s1455_s17 = sphi %s1503_s17, %s1963_s17   ;;  %s1451_s16 = sphi %s1501_s16, %s1962_s16   ;;  %s1447_s15 = sphi %s1499_s15, %s1961_s15  }
   0x5   : > { %s36_s23 = sadd.s32 1, %s1463_s19  ;;  %s157_s24 = sadd.s32 1, %s1455_s17 }
   0x6   : > { %p38_p0 = scmp.ge.s32.totalorder %s36_s23, 2  ;;  %p167_p1 = scmp.ne.s32.totalorder %s1455_s17, %s1451_s16 }
   0x7   : > { %p168_p2 = scmp.eq.s32.totalorder %s1271_s21, 1  ;;  %p173_p3 = scmp.ne.s32.totalorder %s1451_s16, %s1447_s15 }
   0x8   : > { %s1967_s23 = smov (%p38_p0, %s36_s23), 0  ;;  %p174_p5 = scmp.eq.s32.totalorder %s1272_s22, 1 }
   0x9   : > { %p1539_p4 = por %p168_p2, %p167_p1  ;;  %s150_s26 = ssub.s32 %s1463_s19, %s1967_s23 }
   0xa   : > { %p1275_p6 = scmp.ge.s32.totalorder %s1467_s20, 1  ;;  %p155_p7 = scmp.eq.s32.totalorder %s150_s26, 0 }
   0xb   : > { %p1546_p8 = por %p174_p5, %p173_p3  ;;  %p238_p9 = scmp.lt.s32.totalorder %s1467_s20, 3 }
   0xc   : > { %s1552_s28 = scalar_select %p155_p7, %s1455_s17, %s157_s24  }
   0xd   : > { %p239_p10 = pnand %p1275_p6, %p238_p9 }
   0xe   : > { %p291_p11 = scmp.lt.s32.totalorder (!%p239_p10), %s1459_s18, 1  ;;  %s1326_s6 = sshll.u32 (!%p239_p10), %s1459_s18, 13 }
   0xf   : > { %242 = sbr.rel (%p239_p10) target bundleno = 302 (0x12e), region = 36  ;;  %s1471_s12 = smov (!%p239_p10), [#allocation2]  }
  0x10   : > { %s1395_s13 = sshll.u32 (!%p239_p10), %s1471_s12, 4  ;;  %s1396_s13 = int_to_ptr.vmem [resolvable:$false] %s1395_s13 }
  0x14   : > { %v1469_v0 = vmov 0.0   ;;  %s1558_s29 = scalar_select %p291_p11, %s1459_s18, 1  ;;  %v1470_v1 = vmov 0   ;;  %vm463_vm0 = vcmask 1043456   ;;  %vm366_vm1 = vcmask 31744  }
  0x15   : > { %532 = vmatprep.mubr.f32.mxu0 %v1469_v0  ;;  %628 = vmatprep.mubr.f32.mxu1 %v1469_v0  ;;  %s1897_s18 = scalar_lea.hbm %s1958_s4, %s1326_s6 }
  0x16   : > { %1389 = vset.pattern.permute.xlu1 %v1470_v1  ;;  %1388 = vset.pattern.permute.xlu0 %v1470_v1  ;;  %s1323_s30 = sshll.u32 %s1558_s29, 8  ;;  %s1324_s5 = sshll.u32 %s1558_s29, 3 }
  0x17   : > { %s1565_s8 = scalar_lea.vmem %s1954_s0, %s1323_s30  ;;  %s304_s11 = scalar_lea.vmem %s1955_s1, %s1324_s5 }
  0x18   : > { %v331_v2 = vld [vmem:[%s304_s11] sm:$0xff]  ;;  %s1573_s14 = scalar_lea.vmem %s1956_s2, %s1323_s30  ;;  %v333_v8 = vld [vmem:[%s1565_s8 + $0x8] sm:$0xff]  ;;  %v334_v12 = vld [vmem:[%s1565_s8 + $0x10] sm:$0xff]  ;;  %s1283_s21 = sshll.u32 %s1558_s29, 1 }
  0x19   : > { %v365_v3 = vcombine.high %v331_v2, %v331_v2  ;;  %v332_v4 = vld [vmem:[%s1565_s8] sm:$0xff]  ;;  %v727_v6 = vld [vmem:[%s1573_s14 + $0x10] sm:$0xff]  ;;  %v349_v9 = vld [vmem:[%s1565_s8 + $0x88] sm:$0xff]  ;;  %s322_s26 = scalar_lea.vmem %s1957_s3, %s1283_s21  ;;  %s287_s30 = sand.u32 1, %s1451_s16  }
  0x1a   : > { %v348_v5 = vld [vmem:[%s1565_s8 + $0x80] sm:$0xff]  ;;  %769 = vperm.xlu1 %1389, %v727_v6   ;;  %v728_v10 = vld [vmem:[%s1573_s14 + $0x18] sm:$0xff]  ;;  %v726_v11 = vld [vmem:[%s1573_s14 + $0x8] sm:$0xff]  ;;  %s1276_s29 = sshll.u32 %s287_s30, 9  ;;  %s1909_s10 = scalar_lea.sflag [#allocation3], %s287_s30 }
  0x1b   : > { %1284 = vmatprep.subr.msk.mxu0 %vm463_vm0, %v365_v3  ;;  %1327 = vmatprep.subr.msk.mxu1 %vm463_vm0, %v365_v3  ;;  %v725_v7 = vld [vmem:[%s1573_s14] sm:$0xff]  ;;  %v350_v13 = vld [vmem:[%s1565_s8 + $0x90] sm:$0xff]  ;;  %v730_v14 = vld [vmem:[%s1573_s14 + $0x28] sm:$0xff]  ;;  %s1742_s5 = scalar_lea.vmem [#allocation2], %s1276_s29 }
  0x1c   : > { %1285 = vmatpush1.msk.msra.mxu0 %vm463_vm0, %v331_v2  ;;  %1328 = vmatpush1.msk.msra.mxu1 %vm463_vm0, %v331_v2  ;;  %v729_v15 = vld [vmem:[%s1573_s14 + $0x20] sm:$0xff]  ;;  %v335_v16 = vld [vmem:[%s1565_s8 + $0x18] sm:$0xff]  ;;  %v731_v19 = vld [vmem:[%s1573_s14 + $0x30] sm:$0xff]  ;;  %s1140_s7 = sshll.u32 %s1742_s5, 4  ;;  %s1899_s7 = int_to_ptr.vmem [resolvable:$true] %s1140_s7 }
  0x1d   : > { %1286 = vmatmul.mubr.msk.f32.vlgmr.msra.gmra.mxu0 %vm366_vm1, %v332_v4  ;;  %1302 = vmatmul.mubr.msk.f32.vlgmr.msra.gmra.mxu1 %vm366_vm1, %v348_v5  ;;  %v351_v17 = vld [vmem:[%s1565_s8 + $0x98] sm:$0xff]  ;;  %v336_v20 = vld [vmem:[%s1565_s8 + $0x20] sm:$0xff]  ;;  %v734_v22 = vld [vmem:[%s1573_s14 + $0x48] sm:$0xff]  ;;  %s1391_s11 = scalar_lea.vmem %s1899_s7, 8192  ;;  %p1398_p1 = scmp.lt.s32.totalorder %s1899_s7, %s1396_s13 }
  0x1e   : > { %538 = vmatprep.mubr.f32.mxu0 %v1469_v0  ;;  %634 = vmatprep.mubr.f32.mxu1 %v1469_v0  ;;  %v732_v18 = vld [vmem:[%s1573_s14 + $0x38] sm:$0xff]  ;;  %v352_v21 = vld [vmem:[%s1565_s8 + $0xa0] sm:$0xff]  ;;  %v337_v24 = vld [vmem:[%s1565_s8 + $0x28] sm:$0xff]  ;;  %p1392_p12 = scmp.ne.s32.totalorder %s1899_s7, %s1391_s11 }
  0x1f   : > { %759 = vperm.xlu0 %1388, %v725_v7   ;;  %774 = vperm.xlu1 %1389, %v728_v10   ;;  %v733_v23 = vld [vmem:[%s1573_s14 + $0x40] sm:$0xff]  ;;  %v353_v25 = vld [vmem:[%s1565_s8 + $0xa8] sm:$0xff]  ;;  %v736_v26 = vld [vmem:[%s1573_s14 + $0x58] sm:$0xff] }
  0x20   : > { %v735_v27 = vld [vmem:[%s1573_s14 + $0x50] sm:$0xff]  ;;  %v738_v30 = vld [vmem:[%s1573_s14 + $0x68] sm:$0xff]  ;;  %v737_v31 = vld [vmem:[%s1573_s14 + $0x60] sm:$0xff]  ;;  %p1393_p13 = pnand %p1392_p12, %p1539_p4 }
  0x21   : > { %1287 = vmatmul.mubr.msk.f32.gmra.mxu0 %vm366_vm1, %v333_v8  ;;  %1303 = vmatmul.mubr.msk.f32.gmra.mxu1 %vm366_vm1, %v349_v9  ;;  %v338_v28 = vld [vmem:[%s1565_s8 + $0x30] sm:$0xff]  ;;  %v339_v32 = vld [vmem:[%s1565_s8 + $0x38] sm:$0xff]  ;;  %v340_v36 = vld [vmem:[%s1565_s8 + $0x40] sm:$0xff] }
  0x22   : > { %544 = vmatprep.mubr.f32.mxu0 %v1469_v0  ;;  %640 = vmatprep.mubr.f32.mxu1 %v1469_v0  ;;  %v354_v29 = vld [vmem:[%s1565_s8 + $0xb0] sm:$0xff]  ;;  %v355_v33 = vld [vmem:[%s1565_s8 + $0xb8] sm:$0xff]  ;;  %v356_v37 = vld [vmem:[%s1565_s8 + $0xc0] sm:$0xff]  ;;  %p1394_p0 = pneg %p1393_p13 }
  0x23   : > { %764 = vperm.xlu0 %1388, %v726_v11   ;;  %784 = vperm.xlu1 %1389, %v730_v14   ;;  %v740_v34 = vld [vmem:[%s1573_s14 + $0x78] sm:$0xff]  ;;  %v739_v35 = vld [vmem:[%s1573_s14 + $0x70] sm:$0xff]  ;;  %v742_v38 = vld [vmem:[%s1573_s14 + $0x88] sm:$0xff] }
  0x24   : > { %v741_v39 = vld [vmem:[%s1573_s14 + $0x80] sm:$0xff]  ;;  %v341_v40 = vld [vmem:[%s1565_s8 + $0x48] sm:$0xff]  ;;  %v744_v42 = vld [vmem:[%s1573_s14 + $0x98] sm:$0xff] }
  0x25   : > { %1288 = vmatmul.mubr.msk.f32.gmra.mxu0 %vm366_vm1, %v334_v12  ;;  %1304 = vmatmul.mubr.msk.f32.gmra.mxu1 %vm366_vm1, %v350_v13  ;;  %v357_v41 = vld [vmem:[%s1565_s8 + $0xc8] sm:$0xff]  ;;  %v743_v43 = vld [vmem:[%s1573_s14 + $0x90] sm:$0xff]  ;;  %v745_v47 = vld [vmem:[%s1573_s14 + $0xa0] sm:$0xff] }
  0x26   : > { %550 = vmatprep.mubr.f32.mxu0 %v1469_v0  ;;  %646 = vmatprep.mubr.f32.mxu1 %v1469_v0  ;;  %v342_v44 = vld [vmem:[%s1565_s8 + $0x50] sm:$0xff]  ;;  %v746_v46 = vld [vmem:[%s1573_s14 + $0xa8] sm:$0xff]  ;;  %v343_v48 = vld [vmem:[%s1565_s8 + $0x58] sm:$0xff] }
  0x27   : > { %779 = vperm.xlu0 %1388, %v729_v15   ;;  %794 = vperm.xlu1 %1389, %v732_v18   ;;  %v358_v45 = vld [vmem:[%s1565_s8 + $0xd0] sm:$0xff]  ;;  %v359_v49 = vld [vmem:[%s1565_s8 + $0xd8] sm:$0xff]  ;;  %v344_v52 = vld [vmem:[%s1565_s8 + $0x60] sm:$0xff] }
  0x28   : > { %v748_v50 = vld [vmem:[%s1573_s14 + $0xb8] sm:$0xff]  ;;  %v747_v51 = vld [vmem:[%s1573_s14 + $0xb0] sm:$0xff]  ;;  %v360_v53 = vld [vmem:[%s1565_s8 + $0xe0] sm:$0xff] }
  0x29   : > { %1289 = vmatmul.mubr.msk.f32.gmra.mxu0 %vm366_vm1, %v335_v16  ;;  %1305 = vmatmul.mubr.msk.f32.gmra.mxu1 %vm366_vm1, %v351_v17  ;;  %v750_v54 = vld [vmem:[%s1573_s14 + $0xc8] sm:$0xff]  ;;  %v749_v55 = vld [vmem:[%s1573_s14 + $0xc0] sm:$0xff]  ;;  %v752_v58 = vld [vmem:[%s1573_s14 + $0xd8] sm:$0xff]  ;;  %v983_v16 = vlaneseq }
  0x2a   : > { %556 = vmatprep.mubr.f32.mxu0 %v1469_v0  ;;  %652 = vmatprep.mubr.f32.mxu1 %v1469_v0  ;;  %v345_v56 = vld [vmem:[%s1565_s8 + $0x68] sm:$0xff]  ;;  %v751_v59 = vld [vmem:[%s1573_s14 + $0xd0] sm:$0xff]  ;;  %v753_v63 = vld [vmem:[%s1573_s14 + $0xe0] sm:$0xff] }
  0x2b   : > { %789 = vperm.xlu0 %1388, %v731_v19   ;;  %804 = vperm.xlu1 %1389, %v734_v22   ;;  %v361_v57 = vld [vmem:[%s1565_s8 + $0xe8] sm:$0xff]  ;;  %v346_v60 = vld [vmem:[%s1565_s8 + $0x70] sm:$0xff]  ;;  %v347_v1 = vld [vmem:[%s1565_s8 + $0x78] sm:$0xff]  ;;  %v984_v18 = vshrl.u32 %v983_v16, 7 }
  0x2c   : > { %v362_v61 = vld [vmem:[%s1565_s8 + $0xf0] sm:$0xff]  ;;  %v754_v62 = vld [vmem:[%s1573_s14 + $0xe8] sm:$0xff]  ;;  %v363_v2 = vld [vmem:[%s1565_s8 + $0xf8] sm:$0xff] }
  0x2d   : > { %1290 = vmatmul.mubr.msk.f32.gmra.mxu0 %vm366_vm1, %v336_v20  ;;  %1306 = vmatmul.mubr.msk.f32.gmra.mxu1 %vm366_vm1, %v352_v21  ;;  %v756_v3 = vld [vmem:[%s1573_s14 + $0xf8] sm:$0xff]  ;;  %v755_v4 = vld [vmem:[%s1573_s14 + $0xf0] sm:$0xff]  ;;  %v985_v21 = vsub.s32 0, %v984_v18  ;;  %v981_v22 = vld [vmem:[%s322_s26] sm:$0x3]  ;;  %s1397_s14 = scalar_lea.vmem %s1396_s13, 16384 }
  0x2e   : > { %562 = vmatprep.mubr.f32.mxu0 %v1469_v0  ;;  %658 = vmatprep.mubr.f32.mxu1 %v1469_v0  ;;  %p1399_p2 = scmp.lt.s32.totalorder %s1397_s14, %s1391_s11 }
  0x2f   : > { %799 = vperm.xlu0 %1388, %v733_v23   ;;  %814 = vperm.xlu1 %1389, %v736_v26   ;;  %v989_v23 = vsub.s32 1, %v984_v18 }
  0x30   : > { %p1400_p3 = por %p1399_p2, %p1398_p1 }
  0x31   : > { %1291 = vmatmul.mubr.msk.f32.gmra.mxu0 %vm366_vm1, %v337_v24  ;;  %1307 = vmatmul.mubr.msk.f32.gmra.mxu1 %vm366_vm1, %v353_v25  ;;  %v1734_v25 = vrot.slane %v981_v22, %v985_v21 }
  0x32   : > { %568 = vmatprep.mubr.f32.mxu0 %v1469_v0  ;;  %664 = vmatprep.mubr.f32.mxu1 %v1469_v0  ;;  %p1401_p5 = pnand %p1400_p3, %p1394_p0 }
  0x33   : > { %809 = vperm.xlu0 %1388, %v735_v27   ;;  %824 = vperm.xlu1 %1389, %v738_v30  }
  0x35   : > { %1292 = vmatmul.mubr.msk.f32.gmra.mxu0 %vm366_vm1, %v338_v28  ;;  %1308 = vmatmul.mubr.msk.f32.gmra.mxu1 %vm366_vm1, %v354_v29  ;;  %v1738_v29 = vrot.slane %v981_v22, %v989_v23 }
  0x36   : > { %574 = vmatprep.mubr.f32.mxu0 %v1469_v0  ;;  %670 = vmatprep.mubr.f32.mxu1 %v1469_v0 }
  0x37   : > { %819 = vperm.xlu0 %1388, %v737_v31   ;;  %834 = vperm.xlu1 %1389, %v740_v34  }
  0x39   : > { %1293 = vmatmul.mubr.msk.f32.gmra.mxu0 %vm366_vm1, %v339_v32  ;;  %1309 = vmatmul.mubr.msk.f32.gmra.mxu1 %vm366_vm1, %v355_v33 }
  0x3a   : > { %580 = vmatprep.mubr.f32.mxu0 %v1469_v0  ;;  %676 = vmatprep.mubr.f32.mxu1 %v1469_v0 }
  0x3b   : > { %829 = vperm.xlu0 %1388, %v739_v35   ;;  %844 = vperm.xlu1 %1389, %v742_v38  }
  0x3d   : > { %1294 = vmatmul.mubr.msk.f32.gmra.mxu0 %vm366_vm1, %v340_v36  ;;  %1310 = vmatmul.mubr.msk.f32.gmra.mxu1 %vm366_vm1, %v356_v37 }
  0x3e   : > { %586 = vmatprep.mubr.f32.mxu0 %v1469_v0  ;;  %682 = vmatprep.mubr.f32.mxu1 %v1469_v0 }
  0x3f   : > { %839 = vperm.xlu0 %1388, %v741_v39   ;;  %854 = vperm.xlu1 %1389, %v744_v42  }
  0x41   : > { %1295 = vmatmul.mubr.msk.f32.gmra.mxu0 %vm366_vm1, %v341_v40  ;;  %1311 = vmatmul.mubr.msk.f32.gmra.mxu1 %vm366_vm1, %v357_v41 }
  0x42   : > { %592 = vmatprep.mubr.f32.mxu0 %v1469_v0  ;;  %688 = vmatprep.mubr.f32.mxu1 %v1469_v0 }
  0x43   : > { %849 = vperm.xlu0 %1388, %v743_v43   ;;  %864 = vperm.xlu1 %1389, %v746_v46  }
  0x45   : > { %1296 = vmatmul.mubr.msk.f32.gmra.mxu0 %vm366_vm1, %v342_v44  ;;  %1312 = vmatmul.mubr.msk.f32.gmra.mxu1 %vm366_vm1, %v358_v45 }
  0x46   : > { %598 = vmatprep.mubr.f32.mxu0 %v1469_v0  ;;  %694 = vmatprep.mubr.f32.mxu1 %v1469_v0 }
  0x47   : > { %859 = vperm.xlu0 %1388, %v745_v47   ;;  %874 = vperm.xlu1 %1389, %v748_v50  }
  0x49   : > { %1297 = vmatmul.mubr.msk.f32.gmra.mxu0 %vm366_vm1, %v343_v48  ;;  %1313 = vmatmul.mubr.msk.f32.gmra.mxu1 %vm366_vm1, %v359_v49 }
  0x4a   : > { %604 = vmatprep.mubr.f32.mxu0 %v1469_v0  ;;  %700 = vmatprep.mubr.f32.mxu1 %v1469_v0 }
  0x4b   : > { %869 = vperm.xlu0 %1388, %v747_v51   ;;  %884 = vperm.xlu1 %1389, %v750_v54  }
  0x4d   : > { %1298 = vmatmul.mubr.msk.f32.gmra.mxu0 %vm366_vm1, %v344_v52  ;;  %1314 = vmatmul.mubr.msk.f32.gmra.mxu1 %vm366_vm1, %v360_v53 }
  0x4e   : > { %610 = vmatprep.mubr.f32.mxu0 %v1469_v0  ;;  %706 = vmatprep.mubr.f32.mxu1 %v1469_v0 }
  0x4f   : > { %879 = vperm.xlu0 %1388, %v749_v55   ;;  %894 = vperm.xlu1 %1389, %v752_v58  }
  0x51   : > { %1299 = vmatmul.mubr.msk.f32.gmra.mxu0 %vm366_vm1, %v345_v56  ;;  %1315 = vmatmul.mubr.msk.f32.gmra.mxu1 %vm366_vm1, %v361_v57 }
  0x52   : > { %616 = vmatprep.mubr.f32.mxu0 %v1469_v0  ;;  %712 = vmatprep.mubr.f32.mxu1 %v1469_v0 }
  0x53   : > { %889 = vperm.xlu0 %1388, %v751_v59   ;;  %904 = vperm.xlu1 %1389, %v754_v62  }
  0x55   : > { %1300 = vmatmul.mubr.msk.f32.gmra.mxu0 %vm366_vm1, %v346_v60  ;;  %1316 = vmatmul.mubr.msk.f32.gmra.mxu1 %vm366_vm1, %v362_v61 }
  0x56   : > { %622 = vmatprep.mubr.f32.mxu0 %v1469_v0  ;;  %718 = vmatprep.mubr.f32.mxu1 %v1469_v0 }
  0x57   : > { %899 = vperm.xlu0 %1388, %v753_v63   ;;  %914 = vperm.xlu1 %1389, %v756_v3  }
  0x59   : > { %1301 = vmatmul.mubr.msk.f32.gmra.mxu0 %vm366_vm1, %v347_v1  ;;  %1317 = vmatmul.mubr.msk.f32.gmra.mxu1 %vm366_vm1, %v363_v2 }
  0x5b   : > { %909 = vperm.xlu0 %1388, %v755_v4  }
  0x95   : > { %v1701_v6 = vpop.permute.xlu1 %769 }
  0x9a   : > { %v760_v5 = vpop.permute.xlu0 %759  ;;  %v1703_v8 = vpop.permute.xlu1 %774 }
  0x9e   : > { %v765_v7 = vpop.permute.xlu0 %764  ;;  %v1707_v9 = vpop.permute.xlu1 %784 }
  0xa2   : > { %v1705_v0 = vpop.permute.xlu0 %779  ;;  %v1711_v11 = vpop.permute.xlu1 %794 }
  0xa6   : > { %v1709_v10 = vpop.permute.xlu0 %789  ;;  %v1715_v13 = vpop.permute.xlu1 %804 }
  0xaa   : > { %v1713_v12 = vpop.permute.xlu0 %799  ;;  %v1719_v15 = vpop.permute.xlu1 %814 }
  0xae   : > { %v1717_v14 = vpop.permute.xlu0 %809  ;;  %v1724_v19 = vpop.permute.xlu1 %824 }
  0xb2   : > { %v1721_v17 = vpop.permute.xlu0 %819  ;;  %v1732_v24 = vpop.permute.xlu1 %834 }
  0xb6   : > { %v1729_v20 = vpop.permute.xlu0 %829  ;;  %v845_v34 = vpop.permute.xlu1 %844 }
  0xba   : > { %v840_v26 = vpop.permute.xlu0 %839  ;;  %v855_v60 = vpop.permute.xlu1 %854 }
  0xbe   : > { %v850_v47 = vpop.permute.xlu0 %849 }
  0xc2   : > { %v860_v22 = vpop.permute.xlu0 %859 }
  0xdd   : > { %v534_v27 = vpop.f32.mrf.mxu0  ;;  %v630_v28 = vpop.f32.mrf.mxu1 }
  0xde   : > { %v917_v30 = vmul.f32 %v760_v5, %v534_v27  ;;  %v949_v31 = vmul.f32 %v840_v26, %v630_v28 }
  0xdf   : > { %v536_v32 = vpop.f32.mrf.mxu0  ;;  %v632_v33 = vpop.f32.mrf.mxu1 }
  0xe0   : > { %v993_v35 = vmul.f32 %v1734_v25, %v917_v30  ;;  %v1025_v36 = vmul.f32 %v1734_v25, %v949_v31  ;;  %v918_v37 = vmul.f32 %v760_v5, %v536_v32  ;;  %v950_v38 = vmul.f32 %v840_v26, %v632_v33 }
  0xe1   : > { %v540_v39 = vpop.f32.mrf.mxu0  ;;  %v636_v40 = vpop.f32.mrf.mxu1 }
  0xe2   : > { %1057 = vst [vmem:[%s1742_s5] sm:$0xff] %v993_v35  ;;  %1089 = vst [vmem:[%s1742_s5 + $0x100] sm:$0xff] %v1025_v36  ;;  %v994_v41 = vmul.f32 %v1738_v29, %v918_v37  ;;  %v1026_v42 = vmul.f32 %v1738_v29, %v950_v38  ;;  %v919_v43 = vmul.f32 %v765_v7, %v540_v39  ;;  %v865_v37 = vpop.permute.xlu1 %864 }
  0xe3   : > { %v951_v44 = vmul.f32 %v845_v34, %v636_v40  ;;  %v542_v45 = vpop.f32.mrf.mxu0  ;;  %v638_v46 = vpop.f32.mrf.mxu1 }
  0xe4   : > { %1058 = vst [vmem:[%s1742_s5 + $0x8] sm:$0xff] %v994_v41  ;;  %1090 = vst [vmem:[%s1742_s5 + $0x108] sm:$0xff] %v1026_v42  ;;  %v995_v48 = vmul.f32 %v1734_v25, %v919_v43  ;;  %v920_v50 = vmul.f32 %v765_v7, %v542_v45  ;;  %v952_v51 = vmul.f32 %v845_v34, %v638_v46 }
  0xe5   : > { %v1027_v49 = vmul.f32 %v1734_v25, %v951_v44  ;;  %v546_v52 = vpop.f32.mrf.mxu0  ;;  %v642_v53 = vpop.f32.mrf.mxu1 }
  0xe6   : > { %1059 = vst [vmem:[%s1742_s5 + $0x10] sm:$0xff] %v995_v48  ;;  %v996_v54 = vmul.f32 %v1738_v29, %v920_v50  ;;  %v1028_v55 = vmul.f32 %v1738_v29, %v952_v51  ;;  %v921_v56 = vmul.f32 %v1701_v6, %v546_v52  ;;  %v953_v57 = vmul.f32 %v850_v47, %v642_v53 }
  0xe7   : > { %1091 = vst [vmem:[%s1742_s5 + $0x110] sm:$0xff] %v1027_v49  ;;  %v548_v58 = vpop.f32.mrf.mxu0  ;;  %v644_v59 = vpop.f32.mrf.mxu1 }
  0xe8   : > { %1060 = vst [vmem:[%s1742_s5 + $0x18] sm:$0xff] %v996_v54  ;;  %1092 = vst [vmem:[%s1742_s5 + $0x118] sm:$0xff] %v1028_v55  ;;  %v997_v61 = vmul.f32 %v1734_v25, %v921_v56  ;;  %v1029_v62 = vmul.f32 %v1734_v25, %v953_v57  ;;  %v922_v63 = vmul.f32 %v1701_v6, %v548_v58  ;;  %v870_v49 = vpop.permute.xlu0 %869 }
  0xe9   : > { %v954_v1 = vmul.f32 %v850_v47, %v644_v59  ;;  %v552_v2 = vpop.f32.mrf.mxu0  ;;  %v648_v3 = vpop.f32.mrf.mxu1 }
  0xea   : > { %1061 = vst [vmem:[%s1742_s5 + $0x20] sm:$0xff] %v997_v61  ;;  %1093 = vst [vmem:[%s1742_s5 + $0x120] sm:$0xff] %v1029_v62  ;;  %v998_v4 = vmul.f32 %v1738_v29, %v922_v63  ;;  %v923_v7 = vmul.f32 %v1703_v8, %v552_v2  ;;  %v955_v16 = vmul.f32 %v855_v60, %v648_v3  ;;  %v875_v61 = vpop.permute.xlu1 %874 }
  0xeb   : > { %v1030_v5 = vmul.f32 %v1738_v29, %v954_v1  ;;  %v554_v18 = vpop.f32.mrf.mxu0  ;;  %v650_v21 = vpop.f32.mrf.mxu1 }
  0xec   : > { %1062 = vst [vmem:[%s1742_s5 + $0x28] sm:$0xff] %v998_v4  ;;  %v999_v6 = vmul.f32 %v1734_v25, %v923_v7  ;;  %v1031_v23 = vmul.f32 %v1734_v25, %v955_v16  ;;  %v924_v26 = vmul.f32 %v1703_v8, %v554_v18  ;;  %v956_v27 = vmul.f32 %v855_v60, %v650_v21 }
  0xed   : > { %1094 = vst [vmem:[%s1742_s5 + $0x128] sm:$0xff] %v1030_v5  ;;  %v558_v28 = vpop.f32.mrf.mxu0  ;;  %v654_v30 = vpop.f32.mrf.mxu1 }
  0xee   : > { %1063 = vst [vmem:[%s1742_s5 + $0x30] sm:$0xff] %v999_v6  ;;  %1095 = vst [vmem:[%s1742_s5 + $0x130] sm:$0xff] %v1031_v23  ;;  %v1000_v31 = vmul.f32 %v1738_v29, %v924_v26  ;;  %v1032_v32 = vmul.f32 %v1738_v29, %v956_v27  ;;  %v925_v33 = vmul.f32 %v1705_v0, %v558_v28 }
  0xef   : > { %v957_v34 = vmul.f32 %v860_v22, %v654_v30  ;;  %v560_v35 = vpop.f32.mrf.mxu0  ;;  %v656_v36 = vpop.f32.mrf.mxu1 }
  0xf0   : > { %1064 = vst [vmem:[%s1742_s5 + $0x38] sm:$0xff] %v1000_v31  ;;  %1096 = vst [vmem:[%s1742_s5 + $0x138] sm:$0xff] %v1032_v32  ;;  %v1001_v8 = vmul.f32 %v1734_v25, %v925_v33  ;;  %v926_v39 = vmul.f32 %v1705_v0, %v560_v35  ;;  %v958_v40 = vmul.f32 %v860_v22, %v656_v36  ;;  %v880_v22 = vpop.permute.xlu0 %879  ;;  %v885_v36 = vpop.permute.xlu1 %884 }
  0xf1   : > { %v1033_v38 = vmul.f32 %v1734_v25, %v957_v34  ;;  %v564_v41 = vpop.f32.mrf.mxu0  ;;  %v660_v42 = vpop.f32.mrf.mxu1 }
  0xf2   : > { %1065 = vst [vmem:[%s1742_s5 + $0x40] sm:$0xff] %v1001_v8  ;;  %v1002_v43 = vmul.f32 %v1738_v29, %v926_v39  ;;  %v1034_v44 = vmul.f32 %v1738_v29, %v958_v40  ;;  %v927_v45 = vmul.f32 %v1707_v9, %v564_v41  ;;  %v959_v46 = vmul.f32 %v865_v37, %v660_v42 }
  0xf3   : > { %1097 = vst [vmem:[%s1742_s5 + $0x140] sm:$0xff] %v1033_v38  ;;  %v566_v47 = vpop.f32.mrf.mxu0  ;;  %v662_v48 = vpop.f32.mrf.mxu1 }
  0xf4   : > { %1066 = vst [vmem:[%s1742_s5 + $0x48] sm:$0xff] %v1002_v43  ;;  %1098 = vst [vmem:[%s1742_s5 + $0x148] sm:$0xff] %v1034_v44  ;;  %v1003_v0 = vmul.f32 %v1734_v25, %v927_v45  ;;  %v1035_v50 = vmul.f32 %v1734_v25, %v959_v46  ;;  %v928_v51 = vmul.f32 %v1707_v9, %v566_v47  ;;  %v890_v47 = vpop.permute.xlu0 %889 }
  0xf5   : > { %v960_v52 = vmul.f32 %v865_v37, %v662_v48  ;;  %v570_v53 = vpop.f32.mrf.mxu0  ;;  %v666_v54 = vpop.f32.mrf.mxu1 }
  0xf6   : > { %1067 = vst [vmem:[%s1742_s5 + $0x50] sm:$0xff] %v1003_v0  ;;  %1099 = vst [vmem:[%s1742_s5 + $0x150] sm:$0xff] %v1035_v50  ;;  %v1004_v55 = vmul.f32 %v1738_v29, %v928_v51  ;;  %v929_v57 = vmul.f32 %v1709_v10, %v570_v53  ;;  %v961_v58 = vmul.f32 %v870_v49, %v666_v54 }
  0xf7   : > { %v1036_v56 = vmul.f32 %v1738_v29, %v960_v52  ;;  %v572_v59 = vpop.f32.mrf.mxu0  ;;  %v668_v60 = vpop.f32.mrf.mxu1 }
  0xf8   : > { %1068 = vst [vmem:[%s1742_s5 + $0x58] sm:$0xff] %v1004_v55  ;;  %v1005_v9 = vmul.f32 %v1734_v25, %v929_v57  ;;  %v1037_v62 = vmul.f32 %v1734_v25, %v961_v58  ;;  %v930_v63 = vmul.f32 %v1709_v10, %v572_v59  ;;  %v962_v1 = vmul.f32 %v870_v49, %v668_v60  ;;  %v895_v58 = vpop.permute.xlu1 %894 }
  0xf9   : > { %1100 = vst [vmem:[%s1742_s5 + $0x158] sm:$0xff] %v1036_v56  ;;  %v576_v2 = vpop.f32.mrf.mxu0  ;;  %v672_v3 = vpop.f32.mrf.mxu1 }
  0xfa   : > { %1069 = vst [vmem:[%s1742_s5 + $0x60] sm:$0xff] %v1005_v9  ;;  %1101 = vst [vmem:[%s1742_s5 + $0x160] sm:$0xff] %v1037_v62  ;;  %v1006_v4 = vmul.f32 %v1738_v29, %v930_v63  ;;  %v1038_v5 = vmul.f32 %v1738_v29, %v962_v1  ;;  %v931_v7 = vmul.f32 %v1711_v11, %v576_v2 }
  0xfb   : > { %v963_v16 = vmul.f32 %v875_v61, %v672_v3  ;;  %v578_v18 = vpop.f32.mrf.mxu0  ;;  %v674_v21 = vpop.f32.mrf.mxu1 }
  0xfc   : > { %1070 = vst [vmem:[%s1742_s5 + $0x68] sm:$0xff] %v1006_v4  ;;  %1102 = vst [vmem:[%s1742_s5 + $0x168] sm:$0xff] %v1038_v5  ;;  %v1007_v10 = vmul.f32 %v1734_v25, %v931_v7  ;;  %v932_v23 = vmul.f32 %v1711_v11, %v578_v18  ;;  %v964_v26 = vmul.f32 %v875_v61, %v674_v21  ;;  %v900_v7 = vpop.permute.xlu0 %899 }
  0xfd   : > { %v1039_v6 = vmul.f32 %v1734_v25, %v963_v16  ;;  %v582_v27 = vpop.f32.mrf.mxu0  ;;  %v678_v28 = vpop.f32.mrf.mxu1 }
  0xfe   : > { %1071 = vst [vmem:[%s1742_s5 + $0x70] sm:$0xff] %v1007_v10  ;;  %v1008_v30 = vmul.f32 %v1738_v29, %v932_v23  ;;  %v1040_v31 = vmul.f32 %v1738_v29, %v964_v26  ;;  %v933_v32 = vmul.f32 %v1713_v12, %v582_v27  ;;  %v965_v33 = vmul.f32 %v880_v22, %v678_v28 }
  0xff   : > { %1103 = vst [vmem:[%s1742_s5 + $0x170] sm:$0xff] %v1039_v6  ;;  %v584_v34 = vpop.f32.mrf.mxu0  ;;  %v680_v35 = vpop.f32.mrf.mxu1 }
 0x100   : > { %1072 = vst [vmem:[%s1742_s5 + $0x78] sm:$0xff] %v1008_v30  ;;  %1104 = vst [vmem:[%s1742_s5 + $0x178] sm:$0xff] %v1040_v31  ;;  %v1009_v11 = vmul.f32 %v1734_v25, %v933_v32  ;;  %v1041_v37 = vmul.f32 %v1734_v25, %v965_v33  ;;  %v934_v8 = vmul.f32 %v1713_v12, %v584_v34  ;;  %v905_v31 = vpop.permute.xlu1 %904 }
 0x101   : > { %v966_v38 = vmul.f32 %v880_v22, %v680_v35  ;;  %v588_v39 = vpop.f32.mrf.mxu0  ;;  %v684_v40 = vpop.f32.mrf.mxu1 }
 0x102   : > { %1073 = vst [vmem:[%s1742_s5 + $0x80] sm:$0xff] %v1009_v11  ;;  %1105 = vst [vmem:[%s1742_s5 + $0x180] sm:$0xff] %v1041_v37  ;;  %v1010_v41 = vmul.f32 %v1738_v29, %v934_v8  ;;  %v935_v43 = vmul.f32 %v1715_v13, %v588_v39  ;;  %v967_v44 = vmul.f32 %v885_v36, %v684_v40 }
 0x103   : > { %v1042_v42 = vmul.f32 %v1738_v29, %v966_v38  ;;  %v590_v45 = vpop.f32.mrf.mxu0  ;;  %v686_v46 = vpop.f32.mrf.mxu1 }
 0x104   : > { %1074 = vst [vmem:[%s1742_s5 + $0x88] sm:$0xff] %v1010_v41  ;;  %v1011_v12 = vmul.f32 %v1734_v25, %v935_v43  ;;  %v1043_v48 = vmul.f32 %v1734_v25, %v967_v44  ;;  %v936_v49 = vmul.f32 %v1715_v13, %v590_v45  ;;  %v968_v0 = vmul.f32 %v885_v36, %v686_v46  ;;  %v910_v41 = vpop.permute.xlu0 %909 }
 0x105   : > { %1106 = vst [vmem:[%s1742_s5 + $0x188] sm:$0xff] %v1042_v42  ;;  %v594_v50 = vpop.f32.mrf.mxu0  ;;  %v690_v51 = vpop.f32.mrf.mxu1 }
 0x106   : > { %1075 = vst [vmem:[%s1742_s5 + $0x90] sm:$0xff] %v1011_v12  ;;  %1107 = vst [vmem:[%s1742_s5 + $0x190] sm:$0xff] %v1043_v48  ;;  %v1012_v52 = vmul.f32 %v1738_v29, %v936_v49  ;;  %v1044_v53 = vmul.f32 %v1738_v29, %v968_v0  ;;  %v937_v54 = vmul.f32 %v1717_v14, %v594_v50 }
 0x107   : > { %v969_v55 = vmul.f32 %v890_v47, %v690_v51  ;;  %v596_v56 = vpop.f32.mrf.mxu0  ;;  %v692_v57 = vpop.f32.mrf.mxu1 }
 0x108   : > { %1076 = vst [vmem:[%s1742_s5 + $0x98] sm:$0xff] %v1012_v52  ;;  %1108 = vst [vmem:[%s1742_s5 + $0x198] sm:$0xff] %v1044_v53  ;;  %v1013_v13 = vmul.f32 %v1734_v25, %v937_v54  ;;  %v938_v60 = vmul.f32 %v1717_v14, %v596_v56  ;;  %v970_v61 = vmul.f32 %v890_v47, %v692_v57  ;;  %v915_v51 = vpop.permute.xlu1 %914 }
 0x109   : > { %v1045_v59 = vmul.f32 %v1734_v25, %v969_v55  ;;  %v600_v9 = vpop.f32.mrf.mxu0  ;;  %v696_v62 = vpop.f32.mrf.mxu1 }
 0x10a   : > { %1077 = vst [vmem:[%s1742_s5 + $0xa0] sm:$0xff] %v1013_v13  ;;  %v1014_v63 = vmul.f32 %v1738_v29, %v938_v60  ;;  %v1046_v1 = vmul.f32 %v1738_v29, %v970_v61  ;;  %v939_v2 = vmul.f32 %v1719_v15, %v600_v9  ;;  %v971_v3 = vmul.f32 %v895_v58, %v696_v62 }
 0x10b   : > { %1109 = vst [vmem:[%s1742_s5 + $0x1a0] sm:$0xff] %v1045_v59  ;;  %v602_v4 = vpop.f32.mrf.mxu0  ;;  %v698_v5 = vpop.f32.mrf.mxu1 }
 0x10c   : > { %1078 = vst [vmem:[%s1742_s5 + $0xa8] sm:$0xff] %v1014_v63  ;;  %1110 = vst [vmem:[%s1742_s5 + $0x1a8] sm:$0xff] %v1046_v1  ;;  %v1015_v14 = vmul.f32 %v1734_v25, %v939_v2  ;;  %v1047_v16 = vmul.f32 %v1734_v25, %v971_v3  ;;  %v940_v18 = vmul.f32 %v1719_v15, %v602_v4 }
 0x10d   : > { %v972_v21 = vmul.f32 %v895_v58, %v698_v5  ;;  %v606_v22 = vpop.f32.mrf.mxu0  ;;  %v702_v10 = vpop.f32.mrf.mxu1 }
 0x10e   : > { %1079 = vst [vmem:[%s1742_s5 + $0xb0] sm:$0xff] %v1015_v14  ;;  %1111 = vst [vmem:[%s1742_s5 + $0x1b0] sm:$0xff] %v1047_v16  ;;  %v1016_v6 = vmul.f32 %v1738_v29, %v940_v18  ;;  %v941_v26 = vmul.f32 %v1721_v17, %v606_v22  ;;  %v973_v27 = vmul.f32 %v900_v7, %v702_v10 }
 0x10f   : > { %v1048_v23 = vmul.f32 %v1738_v29, %v972_v21  ;;  %v608_v28 = vpop.f32.mrf.mxu0  ;;  %v704_v30 = vpop.f32.mrf.mxu1 }
 0x110   : > { %1080 = vst [vmem:[%s1742_s5 + $0xb8] sm:$0xff] %v1016_v6  ;;  %v1017_v15 = vmul.f32 %v1734_v25, %v941_v26  ;;  %v1049_v32 = vmul.f32 %v1734_v25, %v973_v27  ;;  %v942_v33 = vmul.f32 %v1721_v17, %v608_v28  ;;  %v974_v34 = vmul.f32 %v900_v7, %v704_v30 }
 0x111   : > { %1112 = vst [vmem:[%s1742_s5 + $0x1b8] sm:$0xff] %v1048_v23  ;;  %v612_v35 = vpop.f32.mrf.mxu0  ;;  %v708_v36 = vpop.f32.mrf.mxu1 }
 0x112   : > { %1081 = vst [vmem:[%s1742_s5 + $0xc0] sm:$0xff] %v1017_v15  ;;  %1113 = vst [vmem:[%s1742_s5 + $0x1c0] sm:$0xff] %v1049_v32  ;;  %v1018_v11 = vmul.f32 %v1738_v29, %v942_v33  ;;  %v1050_v37 = vmul.f32 %v1738_v29, %v974_v34  ;;  %v943_v8 = vmul.f32 %v1724_v19, %v612_v35 }
 0x113   : > { %v975_v38 = vmul.f32 %v905_v31, %v708_v36  ;;  %v614_v39 = vpop.f32.mrf.mxu0  ;;  %v710_v40 = vpop.f32.mrf.mxu1 }
 0x114   : > { %1082 = vst [vmem:[%s1742_s5 + $0xc8] sm:$0xff] %v1018_v11  ;;  %1114 = vst [vmem:[%s1742_s5 + $0x1c8] sm:$0xff] %v1050_v37  ;;  %v1019_v17 = vmul.f32 %v1734_v25, %v943_v8  ;;  %v944_v43 = vmul.f32 %v1724_v19, %v614_v39  ;;  %v976_v44 = vmul.f32 %v905_v31, %v710_v40 }
 0x115   : > { %v1051_v42 = vmul.f32 %v1734_v25, %v975_v38  ;;  %v618_v45 = vpop.f32.mrf.mxu0  ;;  %v714_v46 = vpop.f32.mrf.mxu1 }
 0x116   : > { %1083 = vst [vmem:[%s1742_s5 + $0xd0] sm:$0xff] %v1019_v17  ;;  %v1020_v47 = vmul.f32 %v1738_v29, %v944_v43  ;;  %v1052_v12 = vmul.f32 %v1738_v29, %v976_v44  ;;  %v945_v48 = vmul.f32 %v1729_v20, %v618_v45  ;;  %v977_v49 = vmul.f32 %v910_v41, %v714_v46 }
 0x117   : > { %1115 = vst [vmem:[%s1742_s5 + $0x1d0] sm:$0xff] %v1051_v42  ;;  %v620_v0 = vpop.f32.mrf.mxu0  ;;  %v716_v50 = vpop.f32.mrf.mxu1 }
 0x118   : > { %1084 = vst [vmem:[%s1742_s5 + $0xd8] sm:$0xff] %v1020_v47  ;;  %1116 = vst [vmem:[%s1742_s5 + $0x1d8] sm:$0xff] %v1052_v12  ;;  %v1021_v19 = vmul.f32 %v1734_v25, %v945_v48  ;;  %v1053_v52 = vmul.f32 %v1734_v25, %v977_v49  ;;  %v946_v53 = vmul.f32 %v1729_v20, %v620_v0 }
 0x119   : > { %v978_v54 = vmul.f32 %v910_v41, %v716_v50  ;;  %v624_v55 = vpop.f32.mrf.mxu0  ;;  %v720_v56 = vpop.f32.mrf.mxu1 }
 0x11a   : > { %1085 = vst [vmem:[%s1742_s5 + $0xe0] sm:$0xff] %v1021_v19  ;;  %1117 = vst [vmem:[%s1742_s5 + $0x1e0] sm:$0xff] %v1053_v52  ;;  %v1022_v57 = vmul.f32 %v1738_v29, %v946_v53  ;;  %v947_v13 = vmul.f32 %v1732_v24, %v624_v55  ;;  %v979_v59 = vmul.f32 %v915_v51, %v720_v56 }
 0x11b   : > { %v1054_v58 = vmul.f32 %v1738_v29, %v978_v54  ;;  %v626_v60 = vpop.f32.mrf.mxu0  ;;  %v722_v20 = vpop.f32.mrf.mxu1 }
 0x11c   : > { %1086 = vst [vmem:[%s1742_s5 + $0xe8] sm:$0xff] %v1022_v57  ;;  %v1023_v61 = vmul.f32 %v1734_v25, %v947_v13  ;;  %v1055_v9 = vmul.f32 %v1734_v25, %v979_v59  ;;  %v948_v62 = vmul.f32 %v1732_v24, %v626_v60  ;;  %v980_v63 = vmul.f32 %v915_v51, %v722_v20 }
 0x11d   : > { %1118 = vst [vmem:[%s1742_s5 + $0x1e8] sm:$0xff] %v1054_v58 }
 0x11e   : > { %1087 = vst [vmem:[%s1742_s5 + $0xf0] sm:$0xff] %v1023_v61  ;;  %1119 = vst [vmem:[%s1742_s5 + $0x1f0] sm:$0xff] %v1055_v9  ;;  %v1024_v1 = vmul.f32 %v1738_v29, %v948_v62  ;;  %v1056_v2 = vmul.f32 %v1738_v29, %v980_v63 }
 0x120   : > { %1088 = vst [vmem:[%s1742_s5 + $0xf8] sm:$0xff] %v1024_v1  ;;  %1120 = vst [vmem:[%s1742_s5 + $0x1f8] sm:$0xff] %v1056_v2 }
 0x121   : > { %1404 = shalt.err (!%p1401_p5)
}
 0x122   : > { %s1405_s21 = scalar_lea.hbm %s1897_s18, 8192  ;;  %s1409_s26 = scalar_lea.hbm %s1958_s4, 16384 }
 0x123   : > { %p1406_p6 = scmp.ne.s32.totalorder %s1897_s18, %s1405_s21  ;;  %p1410_p10 = scmp.lt.s32.totalorder %s1897_s18, %s1958_s4 }
 0x124   : > { %p1411_p11 = scmp.lt.s32.totalorder %s1409_s26, %s1405_s21 }
 0x125   : > { %p1407_p7 = pnand %p1406_p6, %p1539_p4 }
 0x126   : > { %p1412_p12 = por %p1411_p11, %p1410_p10 }
 0x127   : > { %p1408_p9 = pneg %p1407_p7 }
 0x129   : > { %p1413_p13 = pnand %p1412_p12, %p1408_p9 }
 0x12b   : > { %1416 = shalt.err (!%p1413_p13)
}
 0x12c   : > { %s1472_s5 = smov 256   ;;  %s1473_s6 = smov 16  }
 0x12d   : > { %1329 = dma.vmem_to_hbm [thread:$0]  (%p1539_p4), %s1899_s7, 8192, %s1897_s18, %s1909_s10, %s1472_s5, %s1472_s5, %s1473_s6  }
 0x12e PF: > { %p1335_p0 = scmp.ge.s32.totalorder %s1467_s20, 2  ;;  %s1155_s8 = sand.u32 1, %s1447_s15  }
 0x12f   : > { %s1156_s9 = scalar_lea.sflag [#allocation3], %s1155_s8 }
 0x130   : > { %p1332_p1 = pnand %p1335_p0, %p1546_p8 }
 0x132   : > { %p1333_p2 = pneg %p1332_p1 }
 0x134   : > { %1442 = dma.done.wait (%p1333_p2), %s1156_s9, 8192  }
 0x135   : > { %1444 = vsyncadd (%p1333_p2), %s1156_s9, 4294959104  ;;  %s17_s20 = sadd.s32 1, %s1467_s20   ;;  %s1961_s15 = smov %s1451_s16 }
 0x136   : > { %p14_p3 = scmp.ge.s32.totalorder %s17_s20, 4   ;;  %s1962_s16 = smov %s1455_s17 }
 0x137   : > { %s1963_s17 = smov %s1552_s28  ;;  %s1964_s18 = smov %s1463_s19 }
 0x138   : > { %s1965_s19 = smov %s1967_s23  ;;  %16 = sbr.rel (!%p14_p3) target bundleno = 4 (0x4), region = 81 }
 0x13d   :  { %1161 = vsyncpa [#allocation3], 1 }
 0x13e   :  { %1163 = vsyncpa [#allocation3 + $0x1], 1 }

</bundles_post_ra>
